<compile_context>
chip_gen: v5e
topology: v5e:2x2
jax: 0.10.0
libtpu: 0.0.40
codegen_flags: <defaults>
</compile_context>

<pallas_src>
import jax
import jax.numpy as jnp
from jax.experimental import pallas as pl
from jax.experimental.pallas import tpu as pltpu


def _linear_kernel(x_ref, w_ref, b_ref, o_ref):
    # x_ref: (TM, K), w_ref: (K, N), b_ref: (1, N), o_ref: (TM, N)
    x = x_ref[...].astype(jnp.float32)
    w = w_ref[...].astype(jnp.float32)
    acc = jnp.broadcast_to(b_ref[...].astype(jnp.float32), o_ref.shape)
    k_dim = x_ref.shape[1]  # static (= d_mark, tiny)
    for k in range(k_dim):  # static unroll: K broadcast FMAs on the VPU
        acc = acc + x[:, k:k + 1] * w[k:k + 1, :]
    o_ref[...] = acc.astype(o_ref.dtype)


def time_feature_embedding(x, weight, bias, *, tm=1024, out_dtype=None):
    """x: (B, L, d_mark); weight: (d_mark, d_model); bias: (d_model,)."""
    B, L, d_mark = x.shape
    d_model = weight.shape[1]
    M = B * L
    out_dtype = jnp.dtype(out_dtype) if out_dtype is not None else x.dtype

    x2d = x.reshape(M, d_mark)
    b2d = bias.reshape(1, d_model)

    # VMEM-aware row tile: double-buffered f32 input + output tiles must fit
    # well inside the scoped-VMEM default on every chip generation.
    vmem_budget = 8 * 1024 * 1024                      # bytes for pipelined x/o tiles
    per_row = 4 * (d_mark + d_model) * 2               # f32, double-buffered
    tm_cap = max(8, (vmem_budget // per_row) // 8 * 8)
    # Also cap by the (sublane-padded) row count so tiny inputs still satisfy
    # the block-shape rules, and keep TM a multiple of 8 (sublane).
    tm = max(8, min(int(tm), tm_cap, pl.cdiv(M, 8) * 8))

    m_pad = pl.cdiv(M, tm) * tm
    if m_pad != M:
        # Pad ragged rows so every grid step sees a full (tm, d_mark) tile;
        # padded rows are sliced off after the call.
        x2d = jnp.pad(x2d, ((0, m_pad - M), (0, 0)))

    grid = (m_pad // tm,)

    # Advisory cost estimate: this kernel is HBM-bandwidth bound.
    flops = 2 * M * d_mark * d_model
    bytes_accessed = (
        m_pad * d_mark * x2d.dtype.itemsize
        + d_mark * d_model * weight.dtype.itemsize
        + d_model * bias.dtype.itemsize
        + m_pad * d_model * out_dtype.itemsize
    )

    out2d = pl.pallas_call(
        _linear_kernel,
        out_shape=jax.ShapeDtypeStruct((m_pad, d_model), out_dtype),
        grid_spec=pltpu.PrefetchScalarGridSpec(
            num_scalar_prefetch=0,
            grid=grid,
            in_specs=[
                pl.BlockSpec((tm, d_mark), lambda i: (i, 0)),       # row tile
                pl.BlockSpec((d_mark, d_model), lambda i: (0, 0)),  # resident
                pl.BlockSpec((1, d_model), lambda i: (0, 0)),       # resident
            ],
            out_specs=pl.BlockSpec((tm, d_model), lambda i: (i, 0)),
        ),
        compiler_params=pltpu.CompilerParams(
            # Independent row tiles: let v7x shard them across its 2 TCs.
            dimension_semantics=("parallel",),
        ),
        cost_estimate=pl.CostEstimate(
            flops=flops, transcendentals=0, bytes_accessed=bytes_accessed
        ),
    )(x2d, weight, b2d)

    # NOTE: for d_model < 128 the output writeback uses masked (lane-sparse)
    # stores; realistic d_model (e.g. 512) is lane-dense and unaffected.
    return out2d[:M].reshape(B, L, d_model)


if __name__ == "__main__":
    key = jax.random.PRNGKey(0)
    kx, kw, kb, kx2 = jax.random.split(key, 4)

    B, L, d_mark, d_model = 2, 8, 4, 32

    x = jax.random.normal(kx, (B, L, d_mark), dtype=jnp.float32)
    # Deterministic "Linear" params (PyTorch weight is (d_model, d_mark);
    # we store its transpose directly).
    bound = 1.0 / (d_mark ** 0.5)
    weight = jax.random.uniform(
        kw, (d_mark, d_model), dtype=jnp.float32, minval=-bound, maxval=bound
    )
    bias = jax.random.uniform(
        kb, (d_model,), dtype=jnp.float32, minval=-bound, maxval=bound
    )

    out = time_feature_embedding(x, weight, bias)
    out = jax.block_until_ready(out)

    ref = jnp.einsum("blk,kn->bln", x, weight) + bias
    assert out.shape == (B, L, d_model)
    assert jnp.allclose(out, ref, atol=1e-5, rtol=1e-5)

    # Ragged-M case (B*L = 15, not a multiple of the sublane/tile size) to
    # exercise the padded-rows path.
    B2, L2 = 3, 5
    x2 = jax.random.normal(kx2, (B2, L2, d_mark), dtype=jnp.float32)
    out2 = jax.block_until_ready(time_feature_embedding(x2, weight, bias))
    ref2 = jnp.einsum("blk,kn->bln", x2, weight) + bias
    assert out2.shape == (B2, L2, d_model)
    assert jnp.allclose(out2, ref2, atol=1e-5, rtol=1e-5)

    print("KERNEL_OK")
</pallas_src>

<mosaic_0001>
module attributes {stable_mosaic.version = 11 : i64} {
  func.func @_linear_kernel(%arg0: i32, %arg1: memref<16x4xf32, #tpu.memory_space<vmem>>, %arg2: memref<4x32xf32, #tpu.memory_space<vmem>>, %arg3: memref<1x32xf32, #tpu.memory_space<vmem>>, %arg4: memref<16x32xf32, #tpu.memory_space<vmem>>) attributes {dimension_semantics = [#tpu.dimension_semantics<parallel>], iteration_bounds = array<i64: 1>, scalar_prefetch = 0 : i64, scratch_operands = 0 : i64, tpu.core_type = #tpu.core_type<tc>, window_params = [{transform_indices = @transform_0, window_bounds = array<i64: 16, 4>}, {pipeline_mode = #tpu.pipeline_mode<synchronous>, transform_indices = @transform_1, window_bounds = array<i64: 4, 32>}, {pipeline_mode = #tpu.pipeline_mode<synchronous>, transform_indices = @transform_2, window_bounds = array<i64: 1, 32>}, {transform_indices = @transform_3, window_bounds = array<i64: 16, 32>}]} {
    %c0 = arith.constant 0 : index
    %c0_0 = arith.constant 0 : index
    %0 = vector.load %arg1[%c0, %c0_0] : memref<16x4xf32, #tpu.memory_space<vmem>>, vector<16x4xf32>
    %c0_1 = arith.constant 0 : index
    %c0_2 = arith.constant 0 : index
    %1 = vector.load %arg2[%c0_1, %c0_2] : memref<4x32xf32, #tpu.memory_space<vmem>>, vector<4x32xf32>
    %c0_3 = arith.constant 0 : index
    %c0_4 = arith.constant 0 : index
    %2 = vector.load %arg3[%c0_3, %c0_4] : memref<1x32xf32, #tpu.memory_space<vmem>>, vector<1x32xf32>
    %3 = vector.shape_cast %2 : vector<1x32xf32> to vector<1x32xf32>
    %4 = vector.broadcast %3 : vector<1x32xf32> to vector<16x32xf32>
    %5 = vector.extract_strided_slice %0 {offsets = [0, 0], sizes = [16, 1], strides = [1, 1]} : vector<16x4xf32> to vector<16x1xf32>
    %6 = vector.extract_strided_slice %1 {offsets = [0, 0], sizes = [1, 32], strides = [1, 1]} : vector<4x32xf32> to vector<1x32xf32>
    %7 = vector.broadcast %5 : vector<16x1xf32> to vector<16x32xf32>
    %8 = vector.broadcast %6 : vector<1x32xf32> to vector<16x32xf32>
    %9 = arith.mulf %7, %8 : vector<16x32xf32>
    %10 = arith.addf %4, %9 : vector<16x32xf32>
    %11 = vector.extract_strided_slice %0 {offsets = [0, 1], sizes = [16, 1], strides = [1, 1]} : vector<16x4xf32> to vector<16x1xf32>
    %12 = vector.extract_strided_slice %1 {offsets = [1, 0], sizes = [1, 32], strides = [1, 1]} : vector<4x32xf32> to vector<1x32xf32>
    %13 = vector.broadcast %11 : vector<16x1xf32> to vector<16x32xf32>
    %14 = vector.broadcast %12 : vector<1x32xf32> to vector<16x32xf32>
    %15 = arith.mulf %13, %14 : vector<16x32xf32>
    %16 = arith.addf %10, %15 : vector<16x32xf32>
    %17 = vector.extract_strided_slice %0 {offsets = [0, 2], sizes = [16, 1], strides = [1, 1]} : vector<16x4xf32> to vector<16x1xf32>
    %18 = vector.extract_strided_slice %1 {offsets = [2, 0], sizes = [1, 32], strides = [1, 1]} : vector<4x32xf32> to vector<1x32xf32>
    %19 = vector.broadcast %17 : vector<16x1xf32> to vector<16x32xf32>
    %20 = vector.broadcast %18 : vector<1x32xf32> to vector<16x32xf32>
    %21 = arith.mulf %19, %20 : vector<16x32xf32>
    %22 = arith.addf %16, %21 : vector<16x32xf32>
    %23 = vector.extract_strided_slice %0 {offsets = [0, 3], sizes = [16, 1], strides = [1, 1]} : vector<16x4xf32> to vector<16x1xf32>
    %24 = vector.extract_strided_slice %1 {offsets = [3, 0], sizes = [1, 32], strides = [1, 1]} : vector<4x32xf32> to vector<1x32xf32>
    %25 = vector.broadcast %23 : vector<16x1xf32> to vector<16x32xf32>
    %26 = vector.broadcast %24 : vector<1x32xf32> to vector<16x32xf32>
    %27 = arith.mulf %25, %26 : vector<16x32xf32>
    %28 = arith.addf %22, %27 : vector<16x32xf32>
    %c0_5 = arith.constant 0 : index
    %c0_6 = arith.constant 0 : index
    %29 = vector.load %arg4[%c0_5, %c0_6] : memref<16x32xf32, #tpu.memory_space<vmem>>, vector<16x32xf32>
    tpu.vector_store %arg4[%c0_5, %c0_6], %28 {strides = array<i32>} : memref<16x32xf32, #tpu.memory_space<vmem>>, vector<16x32xf32>,
    return
  }
  func.func @transform_0(%arg0: i32) -> (i32, i32) {
    %c0_i32 = arith.constant 0 : i32
    %c0_i32_0 = arith.constant 0 : i32
    return %arg0, %c0_i32 : i32, i32
  }
  func.func @transform_1(%arg0: i32) -> (i32, i32) {
    %c0_i32 = arith.constant 0 : i32
    %c0_i32_0 = arith.constant 0 : i32
    %c0_i32_1 = arith.constant 0 : i32
    return %c0_i32, %c0_i32_0 : i32, i32
  }
  func.func @transform_2(%arg0: i32) -> (i32, i32) {
    %c0_i32 = arith.constant 0 : i32
    %c0_i32_0 = arith.constant 0 : i32
    %c0_i32_1 = arith.constant 0 : i32
    return %c0_i32, %c0_i32_0 : i32, i32
  }
  func.func @transform_3(%arg0: i32) -> (i32, i32) {
    %c0_i32 = arith.constant 0 : i32
    %c0_i32_0 = arith.constant 0 : i32
    return %arg0, %c0_i32 : i32, i32
  }
}

</mosaic_0001>

<bundles_post_ra>
// kernel: tpu_custom_call.1
= control target key start
LH: loop header
LB: loop body
LE: loop exit
PB: predicated region body
PF: predicated region fallthrough
CT: control target
= control target key end

     0   :  { %v136_v1 = vmov 1   ;;  %v137_v2 = vmov 0   ;;  %s178_s0 = inlined_call_operand.vmem [shape: f32[16,4], index: 0, kind: input, shape index: {}]   ;;  %s179_s1 = inlined_call_operand.vmem [shape: f32[4,32], index: 1, kind: input, shape index: {}]   ;;  %s180_s2 = inlined_call_operand.vmem [shape: f32[1,32], index: 2, kind: input, shape index: {}]   ;;  %s181_s3 = inlined_call_operand.hbm [shape: f32[16,32], index: 3, kind: output, shape index: {}]  }
   0x1   :  { %v15_v0 = vld [vmem:[%s178_s0] sm:$0xff]  ;;  %105 = vset.pattern.permute.xlu1 %v136_v1  ;;  %104 = vset.pattern.permute.xlu0 %v137_v2 }
   0x2   :  { %8 = vsyncpa [#allocation3], 0  ;;  %38 = vperm.xlu1 %105, %v15_v0   ;;  %24 = vperm.xlu0 %104, %v15_v0   ;;  %v138_v3 = vmov 2   ;;  %v16_v4 = vld [vmem:[%s178_s0 + $0x8] sm:$0xff]  ;;  %v139_v5 = vmov 3   ;;  %s140_s0 = smov [#allocation2]  }
   0x3   :  { %106 = vset.pattern.permute.xlu2 %v138_v3  ;;  %v17_v6 = vld [vmem:[%s179_s1] sm:$0xf]  ;;  %s83_s1 = sshll.u32 %s140_s0, 4  ;;  %s85_s21 = sshll.u32 %s181_s3, 4  ;;  %vm76_vm0 = vcmask 261120   ;;  %s84_s1 = int_to_ptr.vmem [resolvable:$true] %s83_s1  ;;  %s86_s21 = int_to_ptr.hbm [resolvable:$true] %s85_s21 }
   0x4   :  { %51 = vperm.xlu2 %106, %v15_v0   ;;  %v32_v9 = vperm.slane %v17_v6, 0  ;;  %v109_v11 = vld [vmem:[%s180_s2] ss:$0 sm:$0xff]  ;;  %v45_v13 = vperm.slane %v17_v6, 1  ;;  %v58_v17 = vperm.slane %v17_v6, 2  ;;  %v71_v26 = vperm.slane %v17_v6, 3 }
   0x5   :  { %s141_s22 = smov 128   ;;  %s142_s23 = smov 8  }
   0xa   :  { %42 = vperm.xlu1 %105, %v16_v4   ;;  %29 = vperm.xlu0 %104, %v16_v4  }
   0xc   :  { %55 = vperm.xlu2 %106, %v16_v4  }
  0x12   :  { %108 = vset.pattern.permute.xlu1 %v139_v5  ;;  %107 = vset.pattern.permute.xlu0 %v139_v5 }
  0x13   :  { %68 = vperm.xlu1 %108, %v16_v4   ;;  %64 = vperm.xlu0 %107, %v15_v0  }
  0x5e   :  { %v52_v10 = vpop.permute.xlu2 %51 }
  0x5f   :  { %v59_v23 = vmul.f32 %v58_v17, %v52_v10 }
  0x66   :  { %v56_v22 = vpop.permute.xlu2 %55 }
  0x67   :  { %v60_v27 = vmul.f32 %v58_v17, %v56_v22 }
  0x74   :  { %v39_v7 = vpop.permute.xlu1 %38  ;;  %v25_v8 = vpop.permute.xlu0 %24 }
  0x75   :  { %v33_v12 = vmul.f32 %v32_v9, %v25_v8  ;;  %v46_v20 = vmul.f32 %v45_v13, %v39_v7 }
  0x77   :  { %v35_v18 = vadd.f32 %v109_v11, %v33_v12 }
  0x79   :  { %v48_v24 = vadd.f32 %v46_v20, %v35_v18 }
  0x7b   :  { %v61_v32 = vadd.f32 %v59_v23, %v48_v24 }
  0x7c   :  { %v43_v14 = vpop.permute.xlu1 %42  ;;  %v30_v15 = vpop.permute.xlu0 %29 }
  0x7d   :  { %v34_v16 = vmul.f32 %v32_v9, %v30_v15  ;;  %v47_v21 = vmul.f32 %v45_v13, %v43_v14 }
  0x7f   :  { %v36_v19 = vadd.f32 %v109_v11, %v34_v16 }
  0x81   :  { %v49_v25 = vadd.f32 %v47_v21, %v36_v19 }
  0x83   :  { %v62_v30 = vadd.f32 %v60_v27, %v49_v25 }
  0x85   :  { %v69_v28 = vpop.permute.xlu1 %68  ;;  %v65_v29 = vpop.permute.xlu0 %64 }
  0x86   :  { %v73_v31 = vmul.f32 %v71_v26, %v69_v28  ;;  %v72_v33 = vmul.f32 %v71_v26, %v65_v29 }
  0x88   :  { %v75_v34 = vadd.f32 %v73_v31, %v62_v30  ;;  %v74_v35 = vadd.f32 %v72_v33, %v61_v32 }
  0x8a   :  { %78 = vst.msk [vmem:[#allocation2 + $0x8] sm:$0xff] %vm76_vm0, %v75_v34 }
  0x8b   :  { %77 = vst.msk [vmem:[#allocation2] sm:$0xff] %vm76_vm0, %v74_v35 }
  0x8c   :  { %91 = dma.vmem_to_hbm [thread:$0]  %s84_s1, 256, %s86_s21, [#allocation3], %s141_s22, %s141_s22, %s142_s23  }
  0x8d   :  { %134 = dma.done.wait [#allocation3], 256  }
  0x8e   :  { %135 = vsyncadd [#allocation3], 4294967040 }
  0x8f   :  { %96 = vsyncpa [#allocation3], 1 }

</bundles_post_ra>
